<compile_context>
chip_gen: v7x
topology: tpu7x:2x2x1
jax: 0.10.0
libtpu: 0.0.40
codegen_flags: <defaults>
</compile_context>

<pallas_src>
import math
import functools

import numpy as np
import jax
import jax.numpy as jnp
from jax.experimental import pallas as pl
from jax.experimental.pallas import tpu as pltpu


def _timestep_projection_kernel(
    t_ref,            # (tile_n, 1) float32
    freqs_ref,        # (1, half_dim) float32 -- grid-resident
    out_ref,          # (tile_n, out_dim) out_dtype
    *,
    half_dim: int,
    scale: float,
    flip_sin_to_cos: bool,
    pad_odd: bool,
):
    t = t_ref[...]                         # (tile_n, 1)
    freqs = freqs_ref[...]                 # (1, half_dim)

    emb = t * freqs                        # (tile_n, half_dim), lane broadcast
    if scale != 1.0:
        emb = scale * emb

    s = jnp.sin(emb)
    c = jnp.cos(emb)
    first, second = (c, s) if flip_sin_to_cos else (s, c)

    lane_aligned = (half_dim % 128 == 0)
    if lane_aligned and not pad_odd:
        # Both halves start at a 128-lane boundary: two unmasked full-width
        # slice stores, no cross-lane data movement.
        out_ref[:, pl.ds(0, half_dim)] = first.astype(out_ref.dtype)
        out_ref[:, pl.ds(half_dim, half_dim)] = second.astype(out_ref.dtype)
    else:
        # Unaligned half_dim (and/or odd embedding_dim): a slice store starting
        # at lane offset half_dim would lower to lane-rotates + vst.msk on every
        # row group.  Build the full lane-dense row in registers (zero pad
        # column folded in) and issue ONE contiguous store -- only the final
        # tail vreg is masked.
        parts = [first, second]
        if pad_odd:
            parts.append(jnp.zeros((t.shape[0], 1), dtype=first.dtype))
        full = jnp.concatenate(parts, axis=-1)
        out_ref[...] = full.astype(out_ref.dtype)


def _vmem_budget_bytes() -> int:
    # 8 MiB per output buffer on the 128-MiB-VMEM parts (v5e/v6e); 4 MiB on
    # v7x (64 MiB physical, 32 MiB scoped default, output is double-buffered).
    try:
        cap = pltpu.get_tpu_info().vmem_capacity_bytes
    except Exception:
        cap = 0
    return (8 if cap >= 100 * 1024 * 1024 else 4) * 1024 * 1024


def _choose_tile_n(n: int, out_dim: int, out_itemsize: int, sublane: int) -> int:
    budget_bytes = _vmem_budget_bytes()
    t = budget_bytes // max(1, out_dim * out_itemsize)
    t = max(sublane, min(1024, (t // sublane) * sublane))
    if n <= 2 * sublane:
        # Tiny batch (the common diffusion case): one tile covering all rows
        # (block == full dim is always a legal block shape).
        return n
    # Cap at ~half the rows (sublane-rounded) so grid_n >= 2 and both v7x
    # TensorCores get work; near-free extra grid step on single-TC chips.
    half_rows = ((((n + 1) // 2) + sublane - 1) // sublane) * sublane
    return max(sublane, min(t, half_rows))


@functools.lru_cache(maxsize=64)
def _freqs_np(half_dim: int, max_period: int, downscale_freq_shift: float):
    # Host constant: exp(-log(max_period) * arange(half) / (half - shift)).
    # NOTE: half_dim == downscale_freq_shift divides by zero (inf/nan) exactly
    # like the PyTorch reference -- intentionally not guarded.
    exponent = -math.log(max_period) * np.arange(half_dim, dtype=np.float64)
    exponent = exponent / (half_dim - downscale_freq_shift)
    return np.exp(exponent).astype(np.float32).reshape(1, max(half_dim, 1))


def timestep_projection(
    timesteps,                     # 1-D array [N]; may be fractional
    embedding_dim: int,
    *,
    max_period: int = 10000,
    downscale_freq_shift: float = 1.0,
    scale: float = 1.0,
    flip_sin_to_cos: bool = False,
    out_dtype=jnp.float32,         # pass jnp.bfloat16 if the consumer is bf16
    tile_n: int | None = None,
):
    assert timesteps.ndim == 1, "Timesteps should be a 1d-array"
    n = timesteps.shape[0]
    half_dim = embedding_dim // 2
    pad_odd = (embedding_dim % 2 == 1)
    out_dim = embedding_dim

    freqs = jnp.asarray(
        _freqs_np(half_dim, int(max_period), float(downscale_freq_shift))
    )
    t2d = timesteps.astype(jnp.float32).reshape(n, 1)

    out_itemsize = jnp.dtype(out_dtype).itemsize
    sublane = 16 if out_itemsize < 4 else 8   # bf16 tiles pack 16 sublanes
    if tile_n is None:
        tile_n = _choose_tile_n(n, out_dim, out_itemsize, sublane)
    grid_n = pl.cdiv(n, tile_n)

    kernel = functools.partial(
        _timestep_projection_kernel,
        half_dim=half_dim,
        scale=scale,
        flip_sin_to_cos=flip_sin_to_cos,
        pad_odd=pad_odd,
    )

    out = pl.pallas_call(
        kernel,
        out_shape=jax.ShapeDtypeStruct((n, out_dim), out_dtype),
        grid_spec=pltpu.PrefetchScalarGridSpec(
            num_scalar_prefetch=0,
            grid=(grid_n,),
            in_specs=[
                pl.BlockSpec((tile_n, 1), lambda i: (i, 0)),        # timesteps
                pl.BlockSpec((1, half_dim), lambda i: (0, 0)),      # resident freqs
            ],
            out_specs=pl.BlockSpec((tile_n, out_dim), lambda i: (i, 0)),
        ),
        compiler_params=pltpu.CompilerParams(
            dimension_semantics=("parallel",),
            vmem_limit_bytes=32 * 1024 * 1024,
        ),
    )(t2d, freqs)
    return out


def _reference_np(timesteps, embedding_dim, *, max_period=10000,
                  downscale_freq_shift=1.0, scale=1.0, flip_sin_to_cos=False):
    """float64 NumPy ground truth, mirroring the PyTorch module exactly."""
    t = np.asarray(timesteps, dtype=np.float64)
    half_dim = embedding_dim // 2
    exponent = -math.log(max_period) * np.arange(half_dim, dtype=np.float64)
    exponent = exponent / (half_dim - downscale_freq_shift)
    freqs = np.exp(exponent)
    emb = t[:, None] * freqs[None, :]
    emb = scale * emb
    emb = np.concatenate([np.sin(emb), np.cos(emb)], axis=-1)
    if flip_sin_to_cos:
        emb = np.concatenate([emb[:, half_dim:], emb[:, :half_dim]], axis=-1)
    if embedding_dim % 2 == 1:
        emb = np.pad(emb, ((0, 0), (0, 1)))
    return emb


if __name__ == "__main__":
    key = jax.random.PRNGKey(0)
    N = 8
    timesteps = jax.random.uniform(key, (N,), dtype=jnp.float32) * 100.0
    ts_np = np.asarray(timesteps)

    # Config 1: even dim, unaligned half_dim (16) -> single full-block store.
    out = timestep_projection(timesteps, 32)
    out = jax.block_until_ready(out)
    ref = _reference_np(ts_np, 32)
    assert out.shape == (N, 32), out.shape
    assert np.allclose(np.asarray(out, np.float64), ref, atol=5e-3, rtol=0.0), \
        "mismatch (even dim 32, no flip)"

    # Config 2: odd dim + flip -> pad column folded into the single store.
    out2 = timestep_projection(timesteps, 33, flip_sin_to_cos=True)
    out2 = jax.block_until_ready(out2)
    ref2 = _reference_np(ts_np, 33, flip_sin_to_cos=True)
    assert out2.shape == (N, 33), out2.shape
    assert np.allclose(np.asarray(out2, np.float64), ref2, atol=5e-3, rtol=0.0), \
        "mismatch (odd dim 33, flip)"

    # Config 3: lane-aligned half_dim (128) + bf16 output -> two unmasked
    # slice stores, halved HBM writeback.
    out3 = timestep_projection(timesteps, 256, flip_sin_to_cos=True,
                               out_dtype=jnp.bfloat16)
    out3 = jax.block_until_ready(out3)
    ref3 = _reference_np(ts_np, 256, flip_sin_to_cos=True)
    assert out3.shape == (N, 256), out3.shape
    assert np.allclose(np.asarray(out3, np.float64), ref3, atol=2e-2, rtol=0.0), \
        "mismatch (dim 256, flip, bf16)"

    # Config 4: multi-tile grid with a partial last tile (writeback clipping).
    N4 = 20
    ts4 = jax.random.uniform(jax.random.PRNGKey(1), (N4,), dtype=jnp.float32) * 50.0
    out4 = timestep_projection(ts4, 32, tile_n=8)
    out4 = jax.block_until_ready(out4)
    ref4 = _reference_np(np.asarray(ts4), 32)
    assert out4.shape == (N4, 32), out4.shape
    assert np.allclose(np.asarray(out4, np.float64), ref4, atol=5e-3, rtol=0.0), \
        "mismatch (partial last tile)"

    print("KERNEL_OK")
</pallas_src>

<mosaic_0001>
module attributes {stable_mosaic.version = 11 : i64} {
  func.func @_timestep_projection_kernel(%arg0: i32, %arg1: memref<8x1xf32, #tpu.memory_space<vmem>>, %arg2: memref<1x16xf32, #tpu.memory_space<vmem>>, %arg3: memref<8x32xf32, #tpu.memory_space<vmem>>) attributes {dimension_semantics = [#tpu.dimension_semantics<parallel>], iteration_bounds = array<i64: 1>, scalar_prefetch = 0 : i64, scratch_operands = 0 : i64, tpu.core_type = #tpu.core_type<tc>, window_params = [{transform_indices = @transform_0, window_bounds = array<i64: 8, 1>}, {pipeline_mode = #tpu.pipeline_mode<synchronous>, transform_indices = @transform_1, window_bounds = array<i64: 1, 16>}, {transform_indices = @transform_2, window_bounds = array<i64: 8, 32>}]} {
    %c0 = arith.constant 0 : index
    %c0_0 = arith.constant 0 : index
    %0 = vector.load %arg1[%c0, %c0_0] : memref<8x1xf32, #tpu.memory_space<vmem>>, vector<8x1xf32>
    %c0_1 = arith.constant 0 : index
    %c0_2 = arith.constant 0 : index
    %1 = vector.load %arg2[%c0_1, %c0_2] : memref<1x16xf32, #tpu.memory_space<vmem>>, vector<1x16xf32>
    %2 = vector.broadcast %0 : vector<8x1xf32> to vector<8x16xf32>
    %3 = vector.broadcast %1 : vector<1x16xf32> to vector<8x16xf32>
    %4 = arith.mulf %2, %3 : vector<8x16xf32>
    %5 = math.sin %4 : vector<8x16xf32>
    %6 = math.cos %4 : vector<8x16xf32>
    %7 = tpu.concatenate %5, %6 in 1 : vector<8x16xf32>, vector<8x16xf32> -> vector<8x32xf32>
    %c0_3 = arith.constant 0 : index
    %c0_4 = arith.constant 0 : index
    %8 = vector.load %arg3[%c0_3, %c0_4] : memref<8x32xf32, #tpu.memory_space<vmem>>, vector<8x32xf32>
    tpu.vector_store %arg3[%c0_3, %c0_4], %7 {strides = array<i32>} : memref<8x32xf32, #tpu.memory_space<vmem>>, vector<8x32xf32>,
    return
  }
  func.func @transform_0(%arg0: i32) -> (i32, i32) {
    %c0_i32 = arith.constant 0 : i32
    %c0_i32_0 = arith.constant 0 : i32
    return %arg0, %c0_i32 : i32, i32
  }
  func.func @transform_1(%arg0: i32) -> (i32, i32) {
    %c0_i32 = arith.constant 0 : i32
    %c0_i32_0 = arith.constant 0 : i32
    %c0_i32_1 = arith.constant 0 : i32
    return %c0_i32, %c0_i32_0 : i32, i32
  }
  func.func @transform_2(%arg0: i32) -> (i32, i32) {
    %c0_i32 = arith.constant 0 : i32
    %c0_i32_0 = arith.constant 0 : i32
    return %arg0, %c0_i32 : i32, i32
  }
}

</mosaic_0001>

<bundles_post_ra>
// kernel: tpu_custom_call.1
= control target key start
LH: loop header
LB: loop body
LE: loop exit
PB: predicated region body
PF: predicated region fallthrough
CT: control target
= control target key end

     0   :  { %v306_v1 = vmov 0   ;;  %s369_s0 = inlined_call_operand.vmem [shape: f32[8,1], index: 0, kind: input, shape index: {}]   ;;  %s370_s1 = inlined_call_operand.vmem [shape: f32[1,16], index: 1, kind: input, shape index: {}]   ;;  %s371_s2 = inlined_call_operand.hbm [shape: f32[8,32], index: 2, kind: output, shape index: {}]  }
   0x1   :  { %v12_v0 = vld [vmem:[%s369_s0] sm:$0xff]  ;;  %277 = vset.pattern.permute.xlu0 %v306_v1 }
   0x2   :  { %16 = vperm.xlu0 %277, %v12_v0  }
   0x3   :  { %7 = vsyncpa [#allocation3], 0  ;;  %v255_v2 = vld [vmem:[%s370_s1] ss:$0 sm:$0xff]  ;;  %v307_v15 = vmov 683565275  }
   0x4   :  { %v308_v17 = vmov 2475754826   ;;  %v309_v20 = vmov 2131351028   ;;  %v310_v23 = vmov 2102212464  }
   0x5   :  { %v311_v26 = vmov 920167782   ;;  %v312_v29 = vmov 1326507024   ;;  %s313_s0 = smov 16   ;;  %s314_s1 = smov [#allocation2]  }
   0x6   :  { %s247_s13 = sshll.u32 %s314_s1, 4  ;;  %s248_s13 = int_to_ptr.vmem [resolvable:$true] %s247_s13 }
   0x7   :  { %s282_s14 = scalar_lea.vmem %s248_s13, 128  ;;  %p287_p1 = scmp.lt.s32.totalorder %s248_s13, %s248_s13 }
   0x8   :  { %p283_p0 = scmp.ne.s32.totalorder %s248_s13, %s282_s14  ;;  %p288_p2 = scmp.lt.s32.totalorder %s282_s14, %s282_s14 }
   0xa   :  { %p289_p3 = por %p288_p2, %p287_p1 }
   0xc   :  { %p290_p4 = pnand %p289_p3, %p283_p0 }
  0x81   :  { %v17_v3 = vpop.permute.xlu0 %16 }
  0x82   :  { %v336_v4 = vmul.f32 %v255_v2, %v17_v3 }
  0x84   :  { %v29_v5 = vand.u32 2139095040, %v336_v4  ;;  %v26_v9 = vand.u32 2147483647, %v336_v4  ;;  %vm28_vm7 = vcmp.lt.s32.totalorder %v336_v4, 0  ;;  %vm118_vm15 = vweird.f32 %v336_v4 }
  0x86   :  { %v30_v6 = vshrl.u32 %v29_v5, 23  ;;  %v33_v12 = vand.u32 8388607, %v26_v9  ;;  %vm27_vm8 = vcmp.le.f32.partialorder %v26_v9, 0.7853982 }
  0x88   :  { %v256_v7 = vadd.s32 4294967169, %v30_v6  ;;  %v34_v31 = vor.u32 8388608, %v33_v12 }
  0x8a   :  { %v36_v8 = vadd.s32 1, %v256_v7  ;;  %v74_v45 = vshll.u32 %v34_v31, 8 }
  0x8c   :  { %vm37_vm0 = vcmp.gt.s32.totalorder %v36_v8, 0 }
  0x8d   :  { %v38_v10 = vsel %vm37_vm0, %v36_v8, 0  ;;  %vm237_vm0 = vcmask 130048  }
  0x8e   :  { %v40_v11 = vand.u32 31, %v38_v10  ;;  %v39_v14 = vshrl.u32 %v38_v10, 5 }
  0x90   :  { %v41_v13 = vsub.s32 32, %v40_v11  ;;  %v43_v16 = vshll.u32 %v307_v15, %v40_v11  ;;  %v46_v18 = vshll.u32 %v308_v17, %v40_v11  ;;  %v49_v22 = vshll.u32 %v309_v20, %v40_v11 }
  0x91   :  { %v52_v25 = vshll.u32 %v310_v23, %v40_v11  ;;  %v55_v28 = vshll.u32 %v311_v26, %v40_v11  ;;  %vm58_vm1 = vcmp.lt.s32.totalorder %v39_v14, 1  ;;  %vm61_vm2 = vcmp.lt.s32.totalorder %v39_v14, 4 }
  0x92   :  { %v44_v19 = vshrl.u32 %v308_v17, %v41_v13  ;;  %v47_v21 = vshrl.u32 %v309_v20, %v41_v13  ;;  %v50_v24 = vshrl.u32 %v310_v23, %v41_v13  ;;  %v53_v27 = vshrl.u32 %v311_v26, %v41_v13 }
  0x93   :  { %v56_v30 = vshrl.u32 %v312_v29, %v41_v13  ;;  %v42_v40 = vshrl.u32 %v307_v15, %v41_v13  ;;  %vm60_vm3 = vcmp.lt.s32.totalorder %v39_v14, 3  ;;  %vm59_vm4 = vcmp.lt.s32.totalorder %v39_v14, 2 }
  0x94   :  { %v45_v32 = vor.u32 %v44_v19, %v43_v16  ;;  %v48_v33 = vor.u32 %v47_v21, %v46_v18  ;;  %v51_v34 = vor.u32 %v50_v24, %v49_v22  ;;  %v54_v35 = vor.u32 %v53_v27, %v52_v25 }
  0x95   :  { %v57_v36 = vor.u32 %v56_v30, %v55_v28 }
  0x96   :  { %v63_v37 = vsel %vm61_vm2, %v51_v34, 2102212464  ;;  %v66_v38 = vsel %vm58_vm1, %v45_v32, %v48_v33  ;;  %v70_v39 = vsel %vm58_vm1, %v48_v33, %v51_v34  ;;  %v67_v41 = vsel %vm61_vm2, %v54_v35, 920167782 }
  0x97   :  { %v71_v42 = vsel %vm61_vm2, %v57_v36, 1326507024  ;;  %v68_v43 = vsel %vm60_vm3, %v51_v34, %v67_v41  ;;  %v62_v46 = vsel %vm58_vm1, %v42_v40, %v45_v32  ;;  %v64_v47 = vsel %vm60_vm3, %v48_v33, %v63_v37 }
  0x98   :  { %v72_v44 = vsel %vm60_vm3, %v54_v35, %v71_v42  ;;  %v69_v48 = vsel %vm59_vm4, %v66_v38, %v68_v43  ;;  %v65_v54 = vsel %vm59_vm4, %v62_v46, %v64_v47  ;;  %vm239_vm1 = vcmask 261120  }
  0x99   :  { %v73_v49 = vsel %vm59_vm4, %v70_v39, %v72_v44  ;;  %v345_v52 = vmul.u32.u64.low %v74_v45, %v69_v48  ;;  %v346_v53 = vmul.u32.u64.high %v74_v45, %v69_v48, %v345_v52  ;;  %v81_v56 = vmul.u32 %v74_v45, %v65_v54 }
  0x9a   :  { %v342_v50 = vmul.u32.u64.low %v74_v45, %v73_v49  ;;  %v343_v51 = vmul.u32.u64.high %v74_v45, %v73_v49, %v342_v50 }
  0x9b   :  { %v84_v55 = vadd.s32 1, %v346_v53 }
  0x9c   :  { %vm83_vm5 = vc.u32 %v343_v51, %v345_v52  ;;  %v82_v5 = vadd.s32 %v345_v52, %v343_v51 }
  0x9d   :  { %v85_v57 = vsel %vm83_vm5, %v84_v55, %v346_v53 }
  0x9e   :  { %v86_v58 = vadd.s32 %v85_v57, %v81_v56 }
  0xa0   :  { %v87_v59 = vadd.s32 536870912, %v86_v58 }
  0xa2   :  { %v88_v60 = vshrl.u32 %v87_v59, 30 }
  0xa4   :  { %v89_v61 = vshll.u32 %v88_v60, 30  ;;  %v112_v18 = vsub.s32 4, %v88_v60 }
  0xa6   :  { %v90_v62 = vsub.s32 %v86_v58, %v89_v61  ;;  %v113_v21 = vsel %vm28_vm7, %v112_v18, %v88_v60 }
  0xa7   :  { %v115_v23 = vsel %vm27_vm8, 0, %v113_v21 }
  0xa8   :  { %v92_v63 = vsub.s32 0, %v90_v62  ;;  %v119_v24 = vadd.s32 3, %v115_v23  ;;  %v223_v26 = vand.u32 3, %v115_v23 }
  0xaa   :  { %v257_v0 = vmin.u32 %v92_v63, %v90_v62  ;;  %v120_v25 = vand.u32 3, %v119_v24  ;;  %vm228_vm10 = vcmp.eq.s32.totalorder %v223_v26, 2  ;;  %vm225_vm12 = vcmp.eq.s32.totalorder %v223_v26, 0 }
  0xab   :  { %vm224_vm14 = vcmp.lt.s32.totalorder %v223_v26, 2 }
  0xac   :  { %v94_v1 = vclz %v257_v0  ;;  %vm125_vm9 = vcmp.eq.s32.totalorder %v120_v25, 2  ;;  %vm122_vm11 = vcmp.eq.s32.totalorder %v120_v25, 0  ;;  %vm121_vm13 = vcmp.lt.s32.totalorder %v120_v25, 2 }
  0xae   :  { %v258_v2 = vadd.s32 4294967294, %v94_v1 }
  0xb0   :  { %vm259_vm6 = vcmp.lt.s32.totalorder %v258_v2, 0 }
  0xb1   :  { %v97_v3 = vsel %vm259_vm6, 0, %v258_v2 }
  0xb2   :  { %v98_v6 = vsub.s32 32, %v97_v3  ;;  %v102_v7 = vsub.s32 4294967266, %v97_v3  ;;  %v99_v8 = vshll.u32 %v90_v62, %v97_v3 }
  0xb4   :  { %v100_v10 = vshrl.u32 %v82_v5, %v98_v6  ;;  %v103_v11 = vadd.s32 127, %v102_v7 }
  0xb6   :  { %v101_v12 = vor.u32 %v100_v10, %v99_v8  ;;  %v104_v13 = vshll.u32 %v103_v11, 23 }
  0xb8   :  { %v105_v14 = vor.u32 4788187, %v104_v13  ;;  %v108_v16 = vcvt.s32.f32 %v101_v12 }
  0xba   :  { %v106_v15 = vand.u32 2147483647, %v105_v14 }
  0xbc   :  { %v109_v17 = vmul.f32 %v108_v16, %v106_v15 }
  0xbe   :  { %v110_v19 = vxor.u32 2147483648, %v109_v17 }
  0xc0   :  { %v111_v20 = vsel %vm28_vm7, %v110_v19, %v109_v17 }
  0xc1   :  { %v114_v22 = vsel %vm27_vm8, %v336_v4, %v111_v20 }
  0xc2   :  { %278 = vcosq.f32 %v114_v22 }
  0xc3   :  { %280 = vsinq.f32 %v114_v22 }
  0xcc   :  { %v279_v27 = vpop.eup %278 }
  0xcd   :  { %v281_v28 = vpop.eup %280  ;;  %v126_v29 = vxor.u32 2147483648, %v279_v27 }
  0xce   :  { %v123_v30 = vxor.u32 2147483648, %v281_v28 }
  0xcf   :  { %v230_v31 = vsel %vm228_vm10, %v126_v29, %v281_v28  ;;  %v127_v32 = vsel %vm125_vm9, %v126_v29, %v281_v28 }
  0xd0   :  { %v227_v9 = vsel %vm225_vm12, %v279_v27, %v123_v30  ;;  %v124_v33 = vsel %vm122_vm11, %v279_v27, %v123_v30 }
  0xd1   :  { %v231_v34 = vsel %vm224_vm14, %v227_v9, %v230_v31  ;;  %v128_v35 = vsel %vm121_vm13, %v124_v33, %v127_v32 }
  0xd2   :  { %v232_v36 = vsel %vm118_vm15, nan, %v231_v34  ;;  %v129_v37 = vsel %vm118_vm15, nan, %v128_v35 }
  0xd3   :  { %234 = vrot.lane.b32.xlu0 %v232_v36, %s313_s0 }
 0x145   :  { %v235_v38 = vpop.permute.xlu0 %234 }
 0x146   :  { %v238_v39 = vsel %vm237_vm0, %v129_v37, %v235_v38 }
 0x147   :  { %240 = vst.msk [vmem:[#allocation2] sm:$0xff] %vm239_vm1, %v238_v39 }
 0x148   :  { %293 = shalt.err (!%p290_p4)
}
 0x149   :  { %s294_s17 = scalar_lea.hbm %s371_s2, 128 }
 0x14a   :  { %p295_p5 = scmp.ne.s32.totalorder %s371_s2, %s294_s17  ;;  %p298_p6 = scmp.lt.u32.totalorder %s294_s17, %s371_s2 }
 0x14c   :  { %p300_p7 = pnand %p298_p6, %p295_p5 }
 0x14e   :  { %303 = shalt.err (!%p300_p7)
}
 0x14f   :  { %250 = dma.vmem_to_hbm [thread:$0]  %s248_s13, 128, %s371_s2, [#allocation3]  }
 0x150   :  { %304 = dma.done.wait [#allocation3], 128  }
 0x151   :  { %305 = vsyncadd [#allocation3], 4294967168 }
 0x152   :  { %254 = vsyncpa [#allocation3], 1 }

</bundles_post_ra>
